<compile_context>
chip_gen: v6e
topology: v6e:2x2x1
jax: 0.10.0
libtpu: 0.0.40
codegen_flags: <defaults>
</compile_context>

<pallas_src>
import jax
import jax.numpy as jnp
from jax import lax
from jax.experimental import pallas as pl
from jax.experimental.pallas import tpu as pltpu


def _residual_conv1x1_kernel(x_ref, w_ref, b_ref, o_ref):
    # x_ref: (C, TM) spatial tile (lane axis = spatial, lane-dense)
    # w_ref: (C_out, C_in) pointwise-conv weight (resident)
    # b_ref: (C_out, 1) bias (resident)
    # o_ref: (C, TM)
    x = x_ref[...]
    w = w_ref[...]
    b = b_ref[...].astype(jnp.float32)
    c_out, c_in = w.shape

    if c_in <= 16:
        # Small channel count: skip the MXU (K << 128 would run it nearly
        # idle); do C_in broadcast MACs on the VPU over the lane-dense axis.
        xf = x.astype(jnp.float32)
        y = b  # (C_out, 1) -> broadcasts to (C_out, TM) on first add
        for ci in range(c_in):  # static unroll, C_in is small
            y = y + w[:, ci:ci + 1].astype(jnp.float32) * xf[ci:ci + 1, :]
    else:
        # y[c_out, m] = sum_ci w[c_out, ci] * x[ci, m]  (MXU, f32 accumulate)
        y = lax.dot_general(
            w, x,
            dimension_numbers=(((1,), (0,)), ((), ())),
            preferred_element_type=jnp.float32) + b

    o_ref[...] = (x.astype(jnp.float32) + y).astype(o_ref.dtype)


def residual_forward(x_nchw, w, b, *, tile_m=1024):
    """out = x + conv1x1(x; w, b).  x: (N,C,H,W), w: (C_out,C_in), b: (C_out,)."""
    n, c, h, wd = x_nchw.shape
    hw = h * wd
    x3d = x_nchw.reshape(n, c, hw)      # free reshape of NCHW (no transpose)
    b2d = b.reshape(c, 1)

    # Full-extent block when the spatial dim is small; otherwise a 128-aligned
    # tile with a masked tail block (grid via cdiv, no divisibility assert).
    tm = hw if hw <= tile_m else tile_m
    grid_s = pl.cdiv(hw, tm)

    itemsize = jnp.dtype(x_nchw.dtype).itemsize
    cost = pl.CostEstimate(
        flops=2 * n * hw * c * c,
        transcendentals=0,
        bytes_accessed=(2 * n * c * hw + c * c + c) * itemsize)

    out3d = pl.pallas_call(
        _residual_conv1x1_kernel,
        out_shape=jax.ShapeDtypeStruct((n, c, hw), x_nchw.dtype),
        grid_spec=pltpu.PrefetchScalarGridSpec(
            num_scalar_prefetch=0,
            grid=(n, grid_s),
            in_specs=[
                # activations: batch dim squeezed, spatial tiled on lanes
                pl.BlockSpec((None, c, tm), lambda i, s: (i, 0, s)),
                # resident weight / bias (constant index_map across the grid)
                pl.BlockSpec((c, c), lambda i, s: (0, 0)),
                pl.BlockSpec((c, 1), lambda i, s: (0, 0)),
            ],
            out_specs=pl.BlockSpec((None, c, tm), lambda i, s: (i, 0, s)),
        ),
        compiler_params=pltpu.CompilerParams(
            dimension_semantics=("parallel", "parallel"),
            vmem_limit_bytes=48 * 1024 * 1024),
        cost_estimate=cost,
    )(x3d, w, b2d)

    return out3d.reshape(n, c, h, wd)


def residual_reference(x_nchw, w, b):
    # Pure-JAX reference: x + 1x1 conv (channel matmul), NCHW throughout.
    y = jnp.einsum("nchw,dc->ndhw", x_nchw, w) + b[None, :, None, None]
    return x_nchw + y


def _run_case(key, n, c, h, w_sp, *, tile_m, atol=1e-5):
    kx, kw, kb = jax.random.split(key, 3)
    x = jax.random.normal(kx, (n, c, h, w_sp), dtype=jnp.float32)
    w = jax.random.normal(kw, (c, c), dtype=jnp.float32) * 0.1
    b = jax.random.normal(kb, (c,), dtype=jnp.float32) * 0.1

    out = jax.block_until_ready(residual_forward(x, w, b, tile_m=tile_m))
    ref = residual_reference(x, w, b)
    assert out.shape == (n, c, h, w_sp)
    assert jnp.allclose(out, ref, atol=atol, rtol=1e-5), "mismatch vs reference"
    return out


if __name__ == "__main__":
    key = jax.random.PRNGKey(0)
    k1, k2, k3 = jax.random.split(key, 3)

    # Primary case (matches the module's small test shapes): VPU path, C=4.
    _run_case(k1, 2, 4, 16, 16, tile_m=1024)
    # Non-divisible spatial size (14x14) with a masked tail block.
    _run_case(k2, 1, 8, 14, 14, tile_m=128)
    # Larger channel count exercises the MXU dot_general path.
    _run_case(k3, 1, 32, 8, 8, tile_m=1024)

    print("KERNEL_OK")
</pallas_src>

<mosaic_0001>
module attributes {stable_mosaic.version = 11 : i64} {
  func.func @_residual_conv1x1_kernel(%arg0: i32, %arg1: i32, %arg2: memref<1x4x256xf32, #tpu.memory_space<vmem>>, %arg3: memref<4x4xf32, #tpu.memory_space<vmem>>, %arg4: memref<4x1xf32, #tpu.memory_space<vmem>>, %arg5: memref<1x4x256xf32, #tpu.memory_space<vmem>>) attributes {dimension_semantics = [#tpu.dimension_semantics<parallel>, #tpu.dimension_semantics<parallel>], iteration_bounds = array<i64: 2, 1>, scalar_prefetch = 0 : i64, scratch_operands = 0 : i64, tpu.core_type = #tpu.core_type<tc>, window_params = [{transform_indices = @transform_0, window_bounds = array<i64: 1, 4, 256>}, {pipeline_mode = #tpu.pipeline_mode<synchronous>, transform_indices = @transform_1, window_bounds = array<i64: 4, 4>}, {pipeline_mode = #tpu.pipeline_mode<synchronous>, transform_indices = @transform_2, window_bounds = array<i64: 4, 1>}, {transform_indices = @transform_3, window_bounds = array<i64: 1, 4, 256>}]} {
    %c0 = arith.constant 0 : index
    %c0_0 = arith.constant 0 : index
    %c0_1 = arith.constant 0 : index
    %0 = vector.load %arg2[%c0, %c0_0, %c0_1] : memref<1x4x256xf32, #tpu.memory_space<vmem>>, vector<1x4x256xf32>
    %1 = vector.shape_cast %0 : vector<1x4x256xf32> to vector<4x256xf32>
    %c0_2 = arith.constant 0 : index
    %c0_3 = arith.constant 0 : index
    %2 = vector.load %arg3[%c0_2, %c0_3] : memref<4x4xf32, #tpu.memory_space<vmem>>, vector<4x4xf32>
    %c0_4 = arith.constant 0 : index
    %c0_5 = arith.constant 0 : index
    %3 = vector.load %arg4[%c0_4, %c0_5] : memref<4x1xf32, #tpu.memory_space<vmem>>, vector<4x1xf32>
    %4 = vector.extract_strided_slice %2 {offsets = [0, 0], sizes = [4, 1], strides = [1, 1]} : vector<4x4xf32> to vector<4x1xf32>
    %5 = vector.extract_strided_slice %1 {offsets = [0, 0], sizes = [1, 256], strides = [1, 1]} : vector<4x256xf32> to vector<1x256xf32>
    %6 = vector.broadcast %4 : vector<4x1xf32> to vector<4x256xf32>
    %7 = vector.broadcast %5 : vector<1x256xf32> to vector<4x256xf32>
    %8 = arith.mulf %6, %7 : vector<4x256xf32>
    %9 = vector.broadcast %3 : vector<4x1xf32> to vector<4x256xf32>
    %10 = arith.addf %9, %8 : vector<4x256xf32>
    %11 = vector.extract_strided_slice %2 {offsets = [0, 1], sizes = [4, 1], strides = [1, 1]} : vector<4x4xf32> to vector<4x1xf32>
    %12 = vector.extract_strided_slice %1 {offsets = [1, 0], sizes = [1, 256], strides = [1, 1]} : vector<4x256xf32> to vector<1x256xf32>
    %13 = vector.broadcast %11 : vector<4x1xf32> to vector<4x256xf32>
    %14 = vector.broadcast %12 : vector<1x256xf32> to vector<4x256xf32>
    %15 = arith.mulf %13, %14 : vector<4x256xf32>
    %16 = arith.addf %10, %15 : vector<4x256xf32>
    %17 = vector.extract_strided_slice %2 {offsets = [0, 2], sizes = [4, 1], strides = [1, 1]} : vector<4x4xf32> to vector<4x1xf32>
    %18 = vector.extract_strided_slice %1 {offsets = [2, 0], sizes = [1, 256], strides = [1, 1]} : vector<4x256xf32> to vector<1x256xf32>
    %19 = vector.broadcast %17 : vector<4x1xf32> to vector<4x256xf32>
    %20 = vector.broadcast %18 : vector<1x256xf32> to vector<4x256xf32>
    %21 = arith.mulf %19, %20 : vector<4x256xf32>
    %22 = arith.addf %16, %21 : vector<4x256xf32>
    %23 = vector.extract_strided_slice %2 {offsets = [0, 3], sizes = [4, 1], strides = [1, 1]} : vector<4x4xf32> to vector<4x1xf32>
    %24 = vector.extract_strided_slice %1 {offsets = [3, 0], sizes = [1, 256], strides = [1, 1]} : vector<4x256xf32> to vector<1x256xf32>
    %25 = vector.broadcast %23 : vector<4x1xf32> to vector<4x256xf32>
    %26 = vector.broadcast %24 : vector<1x256xf32> to vector<4x256xf32>
    %27 = arith.mulf %25, %26 : vector<4x256xf32>
    %28 = arith.addf %22, %27 : vector<4x256xf32>
    %29 = arith.addf %1, %28 : vector<4x256xf32>
    %c0_6 = arith.constant 0 : index
    %c0_7 = arith.constant 0 : index
    %c0_8 = arith.constant 0 : index
    %30 = vector.load %arg5[%c0_6, %c0_7, %c0_8] : memref<1x4x256xf32, #tpu.memory_space<vmem>>, vector<1x4x256xf32>
    %31 = vector.shape_cast %30 : vector<1x4x256xf32> to vector<4x256xf32>
    %32 = vector.shape_cast %29 : vector<4x256xf32> to vector<1x4x256xf32>
    tpu.vector_store %arg5[%c0_6, %c0_7, %c0_8], %32 {strides = array<i32>} : memref<1x4x256xf32, #tpu.memory_space<vmem>>, vector<1x4x256xf32>,
    return
  }
  func.func @transform_0(%arg0: i32, %arg1: i32) -> (i32, i32, i32) {
    %c0_i32 = arith.constant 0 : i32
    %c0_i32_0 = arith.constant 0 : i32
    return %arg0, %c0_i32, %arg1 : i32, i32, i32
  }
  func.func @transform_1(%arg0: i32, %arg1: i32) -> (i32, i32) {
    %c0_i32 = arith.constant 0 : i32
    %c0_i32_0 = arith.constant 0 : i32
    %c0_i32_1 = arith.constant 0 : i32
    return %c0_i32, %c0_i32_0 : i32, i32
  }
  func.func @transform_2(%arg0: i32, %arg1: i32) -> (i32, i32) {
    %c0_i32 = arith.constant 0 : i32
    %c0_i32_0 = arith.constant 0 : i32
    %c0_i32_1 = arith.constant 0 : i32
    return %c0_i32, %c0_i32_0 : i32, i32
  }
  func.func @transform_3(%arg0: i32, %arg1: i32) -> (i32, i32, i32) {
    %c0_i32 = arith.constant 0 : i32
    %c0_i32_0 = arith.constant 0 : i32
    return %arg0, %c0_i32, %arg1 : i32, i32, i32
  }
}

</mosaic_0001>

<bundles_post_ra>
// kernel: tpu_custom_call.1
= control target key start
LH: loop header
LB: loop body
LE: loop exit
PB: predicated region body
PF: predicated region fallthrough
CT: control target
= control target key end

     0   :  { %8 = vsyncpa [#allocation3], 0  ;;  %s795_s0 = inlined_call_operand.hbm [shape: f32[2,4,256], index: 0, kind: input, shape index: {}]   ;;  %s796_s1 = inlined_call_operand.vmem [shape: f32[4,4], index: 1, kind: input, shape index: {}]   ;;  %s797_s2 = inlined_call_operand.vmem [shape: f32[4,1], index: 2, kind: input, shape index: {}]   ;;  %s798_s3 = inlined_call_operand.hbm [shape: f32[2,4,256], index: 3, kind: output, shape index: {}]  }
   0x1   :  { %10 = vsyncpa [#allocation3 + $0x1], 0 }
   0x2   :  { %11 = vsyncpa [#allocation4], 0 }
   0x3   :  { %13 = vsyncpa [#allocation4 + $0x1], 0  ;;  %s651_s12 = smov 0   ;;  %s653_s13 = smov 0  }
   0x4   :  { %s655_s14 = smov 0   ;;  %s657_s15 = smov 0  }
   0x5   :  { %s659_s16 = smov 0   ;;  %s661_s17 = smov 0  }
   0x6 LB: > { %s428_s18 = sadd.s32 4294967295, %s623_s17   ;;  %s429_s19 = sadd.s32 4294967294, %s623_s17   ;;  %s623_s17 = sphi %s661_s17, %s19_s17   ;;  %s619_s16 = sphi %s659_s16, %s810_s16   ;;  %s615_s15 = sphi %s657_s15, %s809_s15   ;;  %s611_s14 = sphi %s655_s14, %s808_s14   ;;  %s607_s13 = sphi %s653_s13, %s807_s13   ;;  %s603_s12 = sphi %s651_s12, %s806_s12  }
   0x7   : > { %s31_s20 = sadd.s32 1, %s619_s16  ;;  %s40_s21 = sadd.s32 1, %s611_s14 }
   0x8   : > { %p33_p0 = scmp.ge.s32.totalorder %s31_s20, 2  ;;  %p47_p1 = scmp.ne.s32.totalorder %s611_s14, %s607_s13 }
   0x9   : > { %p48_p2 = scmp.eq.s32.totalorder %s623_s17, 0  ;;  %p53_p3 = scmp.ne.s32.totalorder %s607_s13, %s603_s12 }
   0xa   : > { %s812_s20 = smov (%p33_p0, %s31_s20), 0  ;;  %p54_p5 = scmp.eq.s32.totalorder %s428_s18, 0 }
   0xb   : > { %p692_p4 = por %p48_p2, %p47_p1  ;;  %s35_s23 = ssub.s32 %s619_s16, %s812_s20 }
   0xc   : > { %p121_p6 = scmp.eq.s32.totalorder %s428_s18, 1  ;;  %p38_p7 = scmp.eq.s32.totalorder %s35_s23, 0 }
   0xd   : > { %p698_p8 = por %p54_p5, %p53_p3  ;;  %p127_p10 = scmp.eq.s32.totalorder %s429_s19, 1 }
   0xe   : > { %p702_p9 = por %p121_p6, %p47_p1  ;;  %p457_p13 = scmp.lt.s32.totalorder %s623_s17, 2 }
   0xf   : > { %s707_s26 = scalar_select %p38_p7, %s611_s14, %s40_s21  }
  0x10   : > { %p709_p11 = por %p127_p10, %p53_p3  ;;  %s153_s28 = sand.u32 1, %s611_s14  }
  0x11   : > { %s432_s29 = sshll.u32 %s153_s28, 3  ;;  %s443_s30 = sshll.u32 %s619_s16, 7 }
  0x12   : > { %s802_s27 = scalar_select %p709_p11, 1, 0 }
  0x13   : > { %s165_s6 = scalar_lea.hbm %s795_s0, %s443_s30  ;;  %s157_s7 = scalar_lea.vmem [#allocation2], %s432_s29 }
  0x14   : > { %s167_s8 = sshll.u32 %s157_s7, 4  ;;  %p722_p0 = pnand %p457_p13, %p692_p4  ;;  %s168_s8 = int_to_ptr.vmem [resolvable:$true] %s167_s8 }
  0x15   : > { %p435_p1 = scmp.ge.s32.totalorder %s623_s17, 1  ;;  %p172_p2 = scmp.lt.s32.totalorder %s623_s17, 3 }
  0x16   : > { %s154_s10 = scalar_lea.sflag [#allocation3], %s153_s28  ;;  %p517_p3 = pneg %p722_p0 }
  0x17   : > { %s528_s11 = scalar_lea.vmem %s168_s8, 128  ;;  %s625_s18 = smov [#allocation2]  }
  0x18   : > { %p529_p5 = scmp.ne.s32.totalorder %s168_s8, %s528_s11  ;;  %s533_s19 = sshll.u32 %s625_s18, 4  ;;  %s534_s19 = int_to_ptr.vmem [resolvable:$false] %s533_s19 }
  0x19   : > { %s535_s21 = scalar_lea.vmem %s534_s19, 256  ;;  %p536_p10 = scmp.lt.s32.totalorder %s168_s8, %s534_s19 }
  0x1a   : > { %p531_p6 = pnand %p529_p5, %p517_p3  ;;  %p537_p12 = scmp.lt.s32.totalorder %s535_s21, %s528_s11 }
  0x1c   : > { %p532_p7 = pneg %p531_p6  ;;  %p538_p4 = por %p537_p12, %p536_p10 }
  0x1e   : > { %p539_p13 = pnand %p538_p4, %p532_p7 }
  0x20   : > { %542 = shalt.err (!%p539_p13)
}
  0x21   : > { %452 = dma.hbm_to_vmem [thread:$0]  (!%p722_p0), %s165_s6, 128, %s168_s8, %s154_s10  }
  0x22   : > { %p173_p11 = pnand %p435_p1, %p172_p2 }
  0x23   : > { %s737_s22 = sand.u32 (!%p173_p11), 1, %s607_s13  }
  0x24   : > { %176 = sbr.rel (%p173_p11) target bundleno = 198 (0xc6), region = 32  ;;  %s436_s23 = sshll.u32 (!%p173_p11), %s737_s22, 3 }
  0x25   : > { %s179_s28 = scalar_lea.sflag (!%p173_p11), [#allocation3], %s737_s22  ;;  %s182_s29 = scalar_lea.vmem (!%p173_p11), [#allocation2], %s436_s23 }
  0x29   : > { %594 = dma.done.wait (%p698_p8), %s179_s28, 128  }
  0x2a   : > { %596 = vsyncadd (%p698_p8), %s179_s28, 4294967168  ;;  %v626_v0 = vmov 0   ;;  %v627_v1 = vmov 1   ;;  %v208_v2 = vld [vmem:[%s796_s1] sm:$0xf]  ;;  %v628_v4 = vmov 2   ;;  %v216_v6 = vlaneseq }
  0x2b   : > { %511 = vset.pattern.permute.xlu0 %v626_v0  ;;  %512 = vset.pattern.permute.xlu1 %v627_v1  ;;  %v209_v3 = vld [vmem:[%s797_s2] sm:$0xf]  ;;  %v629_v5 = vmov 3   ;;  %s444_s24 = sshll.u32 %s615_s15, 7  ;;  %s204_s7 = scalar_lea.vmem [#allocation5], %s436_s23 }
  0x2c   : > { %212 = vperm.xlu0 %511, %v208_v2   ;;  %244 = vperm.xlu1 %512, %v208_v2   ;;  %v217_v7 = vshrl.u32 %v216_v6, 7  ;;  %v207_v10 = vld [vmem:[%s182_s29] sm:$0xff]  ;;  %s344_s8 = sshll.u32 %s204_s7, 4  ;;  %s342_s11 = scalar_lea.hbm %s798_s3, %s444_s24  ;;  %s345_s8 = int_to_ptr.vmem [resolvable:$true] %s344_s8 }
  0x2d   : > { %s328_s18 = scalar_lea.sflag [#allocation4], %s737_s22  ;;  %s543_s19 = scalar_lea.vmem %s345_s8, 128 }
  0x2e   : > { %v218_v8 = vsub.s32 0, %v217_v7  ;;  %v222_v9 = vsub.s32 4, %v217_v7  ;;  %v249_v11 = vsub.s32 1, %v217_v7  ;;  %v253_v12 = vsub.s32 5, %v217_v7  ;;  %p544_p8 = scmp.ne.s32.totalorder %s345_s8, %s543_s19  ;;  %s630_s21 = smov [#allocation5]  }
  0x2f   : > { %v275_v13 = vsub.s32 2, %v217_v7  ;;  %v279_v14 = vsub.s32 6, %v217_v7  ;;  %v301_v21 = vsub.s32 3, %v217_v7  ;;  %v305_v22 = vsub.s32 7, %v217_v7  ;;  %s547_s28 = sshll.u32 %s630_s21, 4  ;;  %s548_s28 = int_to_ptr.vmem [resolvable:$false] %s547_s28 }
  0x30   : > { %238 = vperm.xlu0 %511, %v209_v3   ;;  %513 = vset.pattern.permute.xlu1 %v628_v4  ;;  %v219_v15 = vrot.slane %v207_v10, %v218_v8  ;;  %v223_v16 = vrot.slane %v207_v10, %v222_v9  ;;  %v250_v17 = vrot.slane %v207_v10, %v249_v11  ;;  %p545_p11 = pnand %p544_p8, %p702_p9  ;;  %s549_s15 = scalar_lea.vmem %s548_s28, 256 }
  0x31   : > { %270 = vperm.xlu1 %513, %v208_v2   ;;  %v254_v18 = vrot.slane %v207_v10, %v253_v12  ;;  %v276_v19 = vrot.slane %v207_v10, %v275_v13  ;;  %v280_v20 = vrot.slane %v207_v10, %v279_v14  ;;  %v302_v31 = vrot.slane %v207_v10, %v301_v21  ;;  %p550_p0 = scmp.lt.s32.totalorder %s345_s8, %s548_s28  ;;  %p551_p1 = scmp.lt.s32.totalorder %s549_s15, %s543_s19 }
  0x32   : > { %v229_v23 = vrot.slane %v219_v15, %v218_v8  ;;  %v233_v24 = vrot.slane %v223_v16, %v218_v8  ;;  %v260_v27 = vrot.slane %v250_v17, %v249_v11  ;;  %v306_v32 = vrot.slane %v207_v10, %v305_v22  ;;  %p546_p12 = pneg %p545_p11 }
  0x33   : > { %v264_v28 = vrot.slane %v254_v18, %v249_v11  ;;  %v286_v29 = vrot.slane %v276_v19, %v275_v13  ;;  %v290_v30 = vrot.slane %v280_v20, %v275_v13  ;;  %v312_v43 = vrot.slane %v302_v31, %v301_v21  ;;  %p552_p2 = por %p551_p1, %p550_p0 }
  0x34   : > { %514 = vset.pattern.permute.xlu0 %v629_v5  ;;  %v316_v44 = vrot.slane %v306_v32, %v301_v21 }
  0x35   : > { %296 = vperm.xlu0 %514, %v208_v2   ;;  %p553_p3 = pnand %p552_p2, %p546_p12 }
  0xa7   : > { %v213_v25 = vpop.permute.xlu0 %212  ;;  %v245_v26 = vpop.permute.xlu1 %244 }
  0xa8   : > { %v234_v33 = vmul.f32 %v229_v23, %v213_v25  ;;  %v235_v34 = vmul.f32 %v233_v24, %v213_v25  ;;  %v265_v36 = vmul.f32 %v260_v27, %v245_v26  ;;  %v266_v37 = vmul.f32 %v264_v28, %v245_v26 }
  0xab   : > { %v239_v35 = vpop.permute.xlu0 %238 }
  0xac   : > { %v241_v38 = vadd.f32 %v239_v35, %v234_v33  ;;  %v242_v39 = vadd.f32 %v239_v35, %v235_v34  ;;  %v271_v40 = vpop.permute.xlu1 %270 }
  0xad   : > { %v291_v41 = vmul.f32 %v286_v29, %v271_v40  ;;  %v292_v42 = vmul.f32 %v290_v30, %v271_v40 }
  0xae   : > { %v267_v45 = vadd.f32 %v265_v36, %v241_v38  ;;  %v268_v46 = vadd.f32 %v266_v37, %v242_v39 }
  0xb0   : > { %v293_v47 = vadd.f32 %v291_v41, %v267_v45  ;;  %v294_v48 = vadd.f32 %v292_v42, %v268_v46  ;;  %v297_v49 = vpop.permute.xlu0 %296 }
  0xb1   : > { %v317_v50 = vmul.f32 %v312_v43, %v297_v49  ;;  %v318_v51 = vmul.f32 %v316_v44, %v297_v49 }
  0xb3   : > { %v319_v52 = vadd.f32 %v317_v50, %v293_v47  ;;  %v320_v53 = vadd.f32 %v318_v51, %v294_v48 }
  0xb5   : > { %v323_v54 = vcombine.low %v319_v52, %v320_v53 }
  0xb7   : > { %v325_v55 = vadd.f32 %v323_v54, %v207_v10 }
  0xb9   : > { %326 = vst [vmem:[%s204_s7] sm:$0xff] %v325_v55 }
  0xba   : > { %556 = shalt.err (!%p553_p3)
}
  0xbb   : > { %s557_s23 = scalar_lea.hbm %s342_s11, 128  ;;  %s561_s30 = scalar_lea.hbm %s798_s3, 256 }
  0xbc   : > { %p558_p5 = scmp.ne.s32.totalorder %s342_s11, %s557_s23  ;;  %p562_p10 = scmp.lt.s32.totalorder %s342_s11, %s798_s3 }
  0xbd   : > { %p563_p4 = scmp.lt.s32.totalorder %s561_s30, %s557_s23 }
  0xbe   : > { %p559_p6 = pnand %p558_p5, %p702_p9 }
  0xbf   : > { %p564_p13 = por %p563_p4, %p562_p10 }
  0xc0   : > { %p560_p7 = pneg %p559_p6 }
  0xc2   : > { %p565_p8 = pnand %p564_p13, %p560_p7 }
  0xc4   : > { %568 = shalt.err (!%p565_p8)
}
  0xc5   : > { %447 = dma.vmem_to_hbm [thread:$0]  (%p702_p9), %s345_s8, 128, %s342_s11, %s328_s18  }
  0xc6 PF: > { %s356_s6 = sand.u32 1, %s603_s12   ;;  %p804_p11 = scmp.ne.s32.totalorder %s802_s27, 0 }
  0xc7   : > { %p805_p12 = scmp.ge.s32.totalorder %s623_s17, 2  ;;  %s357_s24 = scalar_lea.sflag [#allocation4], %s356_s6 }
  0xc9   : > { %p454_p0 = pnand %p805_p12, %p804_p11 }
  0xcb   : > { %p455_p1 = pneg %p454_p0 }
  0xcd   : > { %598 = dma.done.wait (%p455_p1), %s357_s24, 128  }
  0xce   : > { %600 = vsyncadd (%p455_p1), %s357_s24, 4294967168  ;;  %s19_s17 = sadd.s32 1, %s623_s17   ;;  %s806_s12 = smov %s607_s13 }
  0xcf   : > { %p16_p2 = scmp.ge.s32.totalorder %s19_s17, 4   ;;  %s807_s13 = smov %s611_s14 }
  0xd0   : > { %s808_s14 = smov %s707_s26  ;;  %s809_s15 = smov %s619_s16 }
  0xd1   : > { %s810_s16 = smov %s812_s20  ;;  %18 = sbr.rel (!%p16_p2) target bundleno = 6 (0x6), region = 77 }
  0xd6   :  { %362 = vsyncpa [#allocation3], 1 }
  0xd7   :  { %364 = vsyncpa [#allocation3 + $0x1], 1 }
  0xd8   :  { %365 = vsyncpa [#allocation4], 1 }
  0xd9   :  { %367 = vsyncpa [#allocation4 + $0x1], 1 }

</bundles_post_ra>
